<compile_context>
chip_gen: v6e
topology: v6e:2x2x1
jax: 0.10.0
libtpu: 0.0.40
codegen_flags: <defaults>
</compile_context>

<pallas_src>
import jax
import jax.numpy as jnp
from jax.experimental import pallas as pl
from jax.experimental.pallas import tpu as pltpu

HIDDEN = 500        # fixed by the module definition (fc1 -> 500)
_MIN_SPLIT_B = 512  # below this, one tile; per-step overhead > any megacore win


def _round_up(x, m):
    return (x + m - 1) // m * m


def _mlp_kernel(x_ref, w1_ref, b1_ref, w2_ref, b2_ref, o_ref):
    # In-kernel bf16 cast of the f32 activation tile (feedback #2).
    xb = x_ref[...].astype(jnp.bfloat16)
    # fc1: (TB, In)bf16 @ (In, Hp)bf16 -> f32 accumulate, bias + ReLU in f32.
    h = jnp.dot(xb, w1_ref[...], preferred_element_type=jnp.float32)
    h = jnp.maximum(h + b1_ref[...], 0.0)
    # dropout(p=0.25) in eval mode -> identity
    # fc2: (TB, Hp)bf16 @ (Hp, Out)bf16 -> f32 accumulate.
    y = jnp.dot(h.astype(jnp.bfloat16), w2_ref[...],
                preferred_element_type=jnp.float32)
    o_ref[...] = (y + b2_ref[...]).astype(o_ref.dtype)


def prepare_params(w1, b1, w2, b2):
    """One-time parameter prep (feedback #3).

    Pads the hidden dim 500 -> 512 (exact: ReLU(0)=0 and zero K-rows of w2
    contribute nothing), casts weights to bf16 for the MXU and reshapes the
    biases to f32 (1, n) rows for in-kernel broadcast.
    """
    In, H = w1.shape
    Out = w2.shape[1]
    Hp = _round_up(H, 128)
    if Hp != H:
        w1 = jnp.pad(w1, ((0, 0), (0, Hp - H)))
        b1 = jnp.pad(b1, (0, Hp - H))
        w2 = jnp.pad(w2, ((0, Hp - H), (0, 0)))
    return (w1.astype(jnp.bfloat16),
            b1.reshape(1, Hp).astype(jnp.float32),
            w2.astype(jnp.bfloat16),
            b2.reshape(1, Out).astype(jnp.float32))


def _choose_tile_b(B, tile_b_max):
    """Batch tile: single full-batch tile when small, else >=2 grid steps
    (multiples of 16) capped at tile_b_max (feedback #1, #5, #6)."""
    if B < _MIN_SPLIT_B:
        return B                      # one tile == full dim; no padding, no copy
    half = -(-B // 2)                 # ceil(B/2): guarantees >= 2 grid steps (v7x)
    return min(tile_b_max, _round_up(half, 16))


def net_forward(x, params, *, tile_b_max=2048):
    """x: (B, In) f32; params from prepare_params(). Returns (B, Out) f32."""
    B, In = x.shape
    w1b, b1_2d, w2b, b2_2d = params
    Hp = w1b.shape[1]
    Out = w2b.shape[1]

    tile_b = _choose_tile_b(B, tile_b_max)
    grid_b = pl.cdiv(B, tile_b)       # uneven last tile handled by Pallas (no x pad)

    return pl.pallas_call(
        _mlp_kernel,
        out_shape=jax.ShapeDtypeStruct((B, Out), jnp.float32),
        grid=(grid_b,),
        in_specs=[
            pl.BlockSpec((tile_b, In), lambda i: (i, 0)),  # x streams (f32; cast in kernel)
            pl.BlockSpec((In, Hp), lambda i: (0, 0)),      # weights/biases stay resident
            pl.BlockSpec((1, Hp), lambda i: (0, 0)),
            pl.BlockSpec((Hp, Out), lambda i: (0, 0)),
            pl.BlockSpec((1, Out), lambda i: (0, 0)),
        ],
        out_specs=pl.BlockSpec((tile_b, Out), lambda i: (i, 0)),
        compiler_params=pltpu.CompilerParams(
            dimension_semantics=("parallel",)),
    )(x, w1b, b1_2d, w2b, b2_2d)


def init_params(key, input_size, hidden, output_size):
    """Deterministic init mimicking nn.Linear's uniform(-1/sqrt(fan_in), ...).
    Weights stored transposed relative to torch: (in_features, out_features)."""
    k1, k2, k3, k4 = jax.random.split(key, 4)
    bound1 = 1.0 / jnp.sqrt(input_size)
    bound2 = 1.0 / jnp.sqrt(hidden)
    w1 = jax.random.uniform(k1, (input_size, hidden), jnp.float32, -bound1, bound1)
    b1 = jax.random.uniform(k2, (hidden,), jnp.float32, -bound1, bound1)
    w2 = jax.random.uniform(k3, (hidden, output_size), jnp.float32, -bound2, bound2)
    b2 = jax.random.uniform(k4, (output_size,), jnp.float32, -bound2, bound2)
    return w1, b1, w2, b2


def _ref_forward_bf16(x, w1, b1, w2, b2):
    """Plain-JAX reference with the same bf16-operand / f32-accumulate recipe."""
    h = jnp.dot(x.astype(jnp.bfloat16), w1.astype(jnp.bfloat16),
                preferred_element_type=jnp.float32) + b1
    h = jnp.maximum(h, 0.0)
    return jnp.dot(h.astype(jnp.bfloat16), w2.astype(jnp.bfloat16),
                   preferred_element_type=jnp.float32) + b2


if __name__ == "__main__":
    key = jax.random.PRNGKey(0)
    kx, kp, kx2 = jax.random.split(key, 3)

    input_size = 32
    output_size = 16

    w1, b1, w2, b2 = init_params(kp, input_size, HIDDEN, output_size)
    params = prepare_params(w1, b1, w2, b2)   # one-time prep (feedback #3)

    fwd = jax.jit(net_forward)

    # --- small batch: single full-batch tile, grid=(1,) ---
    batch = 8
    x = jax.random.normal(kx, (batch, input_size), jnp.float32)
    out = jax.block_until_ready(fwd(x, params))
    assert out.shape == (batch, output_size)
    assert out.dtype == jnp.float32

    # Same-recipe (bf16 operands, f32 accumulation) reference: tight tolerance.
    ref_bf16 = _ref_forward_bf16(x, w1, b1, w2, b2)
    assert jnp.allclose(out, ref_bf16, atol=2e-3, rtol=2e-3)

    # Full-f32 reference of the module's math: loose tolerance (bf16 operands).
    ref_f32 = jnp.maximum(x @ w1 + b1, 0.0) @ w2 + b2
    assert jnp.allclose(out, ref_f32, atol=5e-2, rtol=5e-2)

    # --- larger batch: 2 grid steps -> exercises the megacore-parallel path ---
    batch2 = 1024
    x2 = jax.random.normal(kx2, (batch2, input_size), jnp.float32)
    out2 = jax.block_until_ready(fwd(x2, params))
    assert out2.shape == (batch2, output_size)
    ref2 = _ref_forward_bf16(x2, w1, b1, w2, b2)
    assert jnp.allclose(out2, ref2, atol=2e-3, rtol=2e-3)

    print("KERNEL_OK")
</pallas_src>

<mosaic_0001>
module attributes {stable_mosaic.version = 11 : i64} {
  func.func @_mlp_kernel(%arg0: i32, %arg1: memref<8x32xf32, #tpu.memory_space<vmem>>, %arg2: memref<32x512xbf16, #tpu.memory_space<vmem>>, %arg3: memref<1x512xf32, #tpu.memory_space<vmem>>, %arg4: memref<512x16xbf16, #tpu.memory_space<vmem>>, %arg5: memref<1x16xf32, #tpu.memory_space<vmem>>, %arg6: memref<8x16xf32, #tpu.memory_space<vmem>>) attributes {dimension_semantics = [#tpu.dimension_semantics<parallel>], iteration_bounds = array<i64: 1>, scalar_prefetch = 0 : i64, scratch_operands = 0 : i64, tpu.core_type = #tpu.core_type<tc>, window_params = [{transform_indices = @transform_0, window_bounds = array<i64: 8, 32>}, {pipeline_mode = #tpu.pipeline_mode<synchronous>, transform_indices = @transform_1, window_bounds = array<i64: 32, 512>}, {pipeline_mode = #tpu.pipeline_mode<synchronous>, transform_indices = @transform_2, window_bounds = array<i64: 1, 512>}, {pipeline_mode = #tpu.pipeline_mode<synchronous>, transform_indices = @transform_3, window_bounds = array<i64: 512, 16>}, {pipeline_mode = #tpu.pipeline_mode<synchronous>, transform_indices = @transform_4, window_bounds = array<i64: 1, 16>}, {transform_indices = @transform_5, window_bounds = array<i64: 8, 16>}]} {
    %c0 = arith.constant 0 : index
    %c0_0 = arith.constant 0 : index
    %0 = vector.load %arg1[%c0, %c0_0] : memref<8x32xf32, #tpu.memory_space<vmem>>, vector<8x32xf32>
    %1 = arith.truncf %0 : vector<8x32xf32> to vector<8x32xbf16>
    %c0_1 = arith.constant 0 : index
    %c0_2 = arith.constant 0 : index
    %2 = vector.load %arg2[%c0_1, %c0_2] : memref<32x512xbf16, #tpu.memory_space<vmem>>, vector<32x512xbf16>
    %cst = arith.constant dense<0.000000e+00> : vector<8x512xf32>
    %3 = tpu.matmul %1, %2, %cst {dimension_numbers = #tpu.dot_dimension_numbers<[1], [0], [0], [1], [0, 0, 1, 1], [], []>} : vector<8x32xbf16>, vector<32x512xbf16>, vector<8x512xf32> -> vector<8x512xf32>
    %c0_3 = arith.constant 0 : index
    %c0_4 = arith.constant 0 : index
    %4 = vector.load %arg3[%c0_3, %c0_4] : memref<1x512xf32, #tpu.memory_space<vmem>>, vector<1x512xf32>
    %5 = vector.broadcast %4 : vector<1x512xf32> to vector<8x512xf32>
    %6 = arith.addf %3, %5 : vector<8x512xf32>
    %cst_5 = arith.constant 0.000000e+00 : f32
    %7 = vector.broadcast %cst_5 : f32 to vector<8x512xf32>
    %8 = arith.maximumf %6, %7 : vector<8x512xf32>
    %9 = arith.truncf %8 : vector<8x512xf32> to vector<8x512xbf16>
    %c0_6 = arith.constant 0 : index
    %c0_7 = arith.constant 0 : index
    %10 = vector.load %arg4[%c0_6, %c0_7] : memref<512x16xbf16, #tpu.memory_space<vmem>>, vector<512x16xbf16>
    %cst_8 = arith.constant dense<0.000000e+00> : vector<8x16xf32>
    %11 = tpu.matmul %9, %10, %cst_8 {dimension_numbers = #tpu.dot_dimension_numbers<[1], [0], [0], [1], [0, 0, 1, 1], [], []>} : vector<8x512xbf16>, vector<512x16xbf16>, vector<8x16xf32> -> vector<8x16xf32>
    %c0_9 = arith.constant 0 : index
    %c0_10 = arith.constant 0 : index
    %12 = vector.load %arg5[%c0_9, %c0_10] : memref<1x16xf32, #tpu.memory_space<vmem>>, vector<1x16xf32>
    %13 = vector.broadcast %12 : vector<1x16xf32> to vector<8x16xf32>
    %14 = arith.addf %11, %13 : vector<8x16xf32>
    %c0_11 = arith.constant 0 : index
    %c0_12 = arith.constant 0 : index
    %15 = vector.load %arg6[%c0_11, %c0_12] : memref<8x16xf32, #tpu.memory_space<vmem>>, vector<8x16xf32>
    tpu.vector_store %arg6[%c0_11, %c0_12], %14 {strides = array<i32>} : memref<8x16xf32, #tpu.memory_space<vmem>>, vector<8x16xf32>,
    return
  }
  func.func @transform_0(%arg0: i32) -> (i32, i32) {
    %c0_i32 = arith.constant 0 : i32
    %c0_i32_0 = arith.constant 0 : i32
    return %arg0, %c0_i32 : i32, i32
  }
  func.func @transform_1(%arg0: i32) -> (i32, i32) {
    %c0_i32 = arith.constant 0 : i32
    %c0_i32_0 = arith.constant 0 : i32
    %c0_i32_1 = arith.constant 0 : i32
    return %c0_i32, %c0_i32_0 : i32, i32
  }
  func.func @transform_2(%arg0: i32) -> (i32, i32) {
    %c0_i32 = arith.constant 0 : i32
    %c0_i32_0 = arith.constant 0 : i32
    %c0_i32_1 = arith.constant 0 : i32
    return %c0_i32, %c0_i32_0 : i32, i32
  }
  func.func @transform_3(%arg0: i32) -> (i32, i32) {
    %c0_i32 = arith.constant 0 : i32
    %c0_i32_0 = arith.constant 0 : i32
    %c0_i32_1 = arith.constant 0 : i32
    return %c0_i32, %c0_i32_0 : i32, i32
  }
  func.func @transform_4(%arg0: i32) -> (i32, i32) {
    %c0_i32 = arith.constant 0 : i32
    %c0_i32_0 = arith.constant 0 : i32
    %c0_i32_1 = arith.constant 0 : i32
    return %c0_i32, %c0_i32_0 : i32, i32
  }
  func.func @transform_5(%arg0: i32) -> (i32, i32) {
    %c0_i32 = arith.constant 0 : i32
    %c0_i32_0 = arith.constant 0 : i32
    return %arg0, %c0_i32 : i32, i32
  }
}

</mosaic_0001>

<bundles_post_ra>
// kernel: net_forward.1
= control target key start
LH: loop header
LB: loop body
LE: loop exit
PB: predicated region body
PF: predicated region fallthrough
CT: control target
= control target key end

     0   :  { %v702_v2 = vmov 0   ;;  %vm94_vm0 = vcmask 261120   ;;  %s866_s0 = inlined_call_operand.vmem [shape: f32[8,32], index: 0, kind: input, shape index: {}]   ;;  %s867_s1 = inlined_call_operand.vmem [shape: bf16[32,512], index: 1, kind: input, shape index: {}]   ;;  %s868_s2 = inlined_call_operand.vmem [shape: f32[1,512], index: 2, kind: input, shape index: {}]   ;;  %s869_s3 = inlined_call_operand.vmem [shape: bf16[512,16], index: 3, kind: input, shape index: {}]   ;;  %s870_s4 = inlined_call_operand.vmem [shape: f32[1,16], index: 4, kind: input, shape index: {}]   ;;  %s871_s5 = inlined_call_operand.hbm [shape: f32[8,16], index: 5, kind: output, shape index: {}]  }
   0x1   :  { %v636_v0 = vld [vmem:[%s867_s1 + $0x24] ss:$16 sps:$4 sm:$0xff]   ;;  %v638_v1 = vld [vmem:[%s867_s1 + $0x2c] ss:$16 sps:$4 sm:$0xff]   ;;  %130 = vmatprep.mubr.bf16.mxu0 %v702_v2  ;;  %171 = vmatprep.mubr.bf16.mxu1 %v702_v2  ;;  %v640_v3 = vld [vmem:[%s867_s1 + $0x20] ss:$16 sps:$4 sm:$0xff]  }
   0x2   :  { %110 = vmatprep.subr.bf16.mxu0 %v636_v0  ;;  %v641_v4 = vld [vmem:[%s867_s1 + $0x28] ss:$16 sps:$4 sm:$0xff]   ;;  %151 = vmatprep.subr.bf16.mxu1 %v638_v1  ;;  %v642_v5 = vld [vmem:[%s867_s1 + $0x4] ss:$16 sps:$4 sm:$0xff]   ;;  %v644_v6 = vld [vmem:[%s867_s1 + $0xc] ss:$16 sps:$4 sm:$0xff]  }
   0x3   :  { %111 = vmatpush1.bf16.msra.mxu0 %v640_v3  ;;  %152 = vmatpush1.bf16.msra.mxu1 %v641_v4  ;;  %v646_v7 = vld [vmem:[%s867_s1] ss:$16 sps:$4 sm:$0xff]   ;;  %v647_v8 = vld [vmem:[%s867_s1 + $0x8] ss:$16 sps:$4 sm:$0xff]  }
   0x4   :  { %112 = vmatprep.subr.bf16.mxu0 %v642_v5  ;;  %v22_v9 = vld [vmem:[%s866_s0] sm:$0xff]  ;;  %153 = vmatprep.subr.bf16.mxu1 %v644_v6  ;;  %v648_v10 = vld [vmem:[%s869_s3 + $0x78] sm:$0xff]   ;;  %v652_v15 = vld [vmem:[%s869_s3 + $0x70] sm:$0xff]  }
   0x5   :  { %v23_v11 = vpack.c.bf16 %v22_v9, %v22_v9  ;;  %v649_v12 = vld [vmem:[%s869_s3 + $0xf8] sm:$0xff]   ;;  %v653_v16 = vld [vmem:[%s869_s3 + $0xf0] sm:$0xff]   ;;  %v656_v19 = vld [vmem:[%s869_s3 + $0x68] sm:$0xff]  }
   0x6   :  { %v650_v13 = vld [vmem:[%s869_s3 + $0x38] sm:$0xff]   ;;  %v654_v17 = vld [vmem:[%s869_s3 + $0x30] sm:$0xff]   ;;  %v657_v20 = vld [vmem:[%s869_s3 + $0xe8] sm:$0xff]  }
   0x7   :  { %113 = vmatpush1.bf16.msra.mxu0 %v646_v7  ;;  %154 = vmatpush1.bf16.msra.mxu1 %v647_v8  ;;  %v651_v14 = vld [vmem:[%s869_s3 + $0xb8] sm:$0xff]   ;;  %v655_v18 = vld [vmem:[%s869_s3 + $0xb0] sm:$0xff]   ;;  %v658_v21 = vld [vmem:[%s869_s3 + $0x28] sm:$0xff]  }
   0x8   :  { %590 = vmatprep.subr.bf16.mxu0 %v648_v10  ;;  %612 = vmatprep.subr.bf16.mxu1 %v649_v12  ;;  %v659_v22 = vld [vmem:[%s869_s3 + $0xa8] sm:$0xff]   ;;  %v660_v23 = vld [vmem:[%s869_s3 + $0x60] sm:$0xff]   ;;  %v664_v27 = vld [vmem:[%s869_s3 + $0x58] sm:$0xff]  }
   0x9   :  { %v661_v24 = vld [vmem:[%s869_s3 + $0xe0] sm:$0xff]   ;;  %v665_v28 = vld [vmem:[%s869_s3 + $0xd8] sm:$0xff]   ;;  %v668_v31 = vld [vmem:[%s869_s3 + $0x50] sm:$0xff]  }
   0xa   :  { %555 = vmatmul.mubr.msk.bf16.vlgmr.msra.gmra.mxu0 %vm94_vm0, %v23_v11  ;;  %556 = vmatmul.mubr.msk.bf16.vlgmr.msra.gmra.mxu1 %vm94_vm0, %v23_v11  ;;  %v662_v25 = vld [vmem:[%s869_s3 + $0x20] sm:$0xff]   ;;  %v666_v29 = vld [vmem:[%s869_s3 + $0x18] sm:$0xff]   ;;  %v669_v32 = vld [vmem:[%s869_s3 + $0xd0] sm:$0xff]  }
   0xb   :  { %591 = vmatpush3.bf16.msra.mxu0 %v650_v13  ;;  %613 = vmatpush3.bf16.msra.mxu1 %v651_v14  ;;  %v663_v26 = vld [vmem:[%s869_s3 + $0xa0] sm:$0xff]   ;;  %v667_v30 = vld [vmem:[%s869_s3 + $0x98] sm:$0xff]   ;;  %v670_v33 = vld [vmem:[%s869_s3 + $0x10] sm:$0xff]  }
   0xc   :  { %592 = vmatprep.subr.bf16.mxu0 %v652_v15  ;;  %614 = vmatprep.subr.bf16.mxu1 %v653_v16  ;;  %v671_v34 = vld [vmem:[%s869_s3 + $0x90] sm:$0xff]  }
   0xf   :  { %593 = vmatpush3.bf16.msra.mxu0 %v654_v17  ;;  %615 = vmatpush3.bf16.msra.mxu1 %v655_v18 }
  0x10   :  { %594 = vmatprep.subr.bf16.mxu0 %v656_v19  ;;  %616 = vmatprep.subr.bf16.mxu1 %v657_v20 }
  0x13   :  { %595 = vmatpush3.bf16.msra.mxu0 %v658_v21  ;;  %617 = vmatpush3.bf16.msra.mxu1 %v659_v22 }
  0x14   :  { %596 = vmatprep.subr.bf16.mxu0 %v660_v23  ;;  %618 = vmatprep.subr.bf16.mxu1 %v661_v24 }
  0x17   :  { %597 = vmatpush3.bf16.msra.mxu0 %v662_v25  ;;  %619 = vmatpush3.bf16.msra.mxu1 %v663_v26 }
  0x18   :  { %598 = vmatprep.subr.bf16.mxu0 %v664_v27  ;;  %620 = vmatprep.subr.bf16.mxu1 %v665_v28 }
  0x1b   :  { %599 = vmatpush3.bf16.msra.mxu0 %v666_v29  ;;  %621 = vmatpush3.bf16.msra.mxu1 %v667_v30 }
  0x1c   :  { %600 = vmatprep.subr.bf16.mxu0 %v668_v31  ;;  %622 = vmatprep.subr.bf16.mxu1 %v669_v32 }
  0x1f   :  { %601 = vmatpush3.bf16.msra.mxu0 %v670_v33  ;;  %623 = vmatpush3.bf16.msra.mxu1 %v671_v34 }
  0x20   :  { %10 = vsyncpa [#allocation3], 0  ;;  %v672_v35 = vld [vmem:[%s869_s3 + $0x48] sm:$0xff]   ;;  %v676_v39 = vld [vmem:[%s869_s3 + $0x40] sm:$0xff]   ;;  %v34_v43 = vlaneseq  ;;  %s703_s21 = smov [#allocation2]   ;;  %vm531_vm1 = vcmask 130048  }
  0x21   :  { %v673_v36 = vld [vmem:[%s869_s3 + $0xc8] sm:$0xff]   ;;  %602 = vmatprep.subr.bf16.mxu0 %v672_v35  ;;  %v677_v40 = vld [vmem:[%s869_s3 + $0xc0] sm:$0xff]   ;;  %s539_s22 = sshll.u32 %s703_s21, 4  ;;  %s540_s22 = int_to_ptr.vmem [resolvable:$true] %s539_s22 }
  0x22   :  { %v674_v37 = vld [vmem:[%s869_s3 + $0x8] sm:$0xff]   ;;  %624 = vmatprep.subr.bf16.mxu1 %v673_v36  ;;  %v678_v41 = vld [vmem:[%s869_s3] sm:$0xff]   ;;  %v35_v44 = vshrl.u32 %v34_v43, 7  ;;  %s680_s23 = scalar_lea.vmem %s540_s22, 128  ;;  %p685_p1 = scmp.lt.s32.totalorder %s540_s22, %s540_s22 }
  0x23   :  { %v675_v38 = vld [vmem:[%s869_s3 + $0x88] sm:$0xff]   ;;  %603 = vmatpush3.bf16.msra.mxu0 %v674_v37  ;;  %v679_v42 = vld [vmem:[%s869_s3 + $0x80] sm:$0xff]   ;;  %p681_p0 = scmp.ne.s32.totalorder %s540_s22, %s680_s23  ;;  %p686_p2 = scmp.lt.s32.totalorder %s680_s23, %s680_s23 }
  0x24   :  { %625 = vmatpush3.bf16.msra.mxu1 %v675_v38  ;;  %604 = vmatprep.subr.bf16.mxu0 %v676_v39  ;;  %v36_v45 = vsub.s32 0, %v35_v44  ;;  %v44_v46 = vsub.s32 2, %v35_v44  ;;  %v32_v47 = vld [vmem:[%s868_s2] sm:$0xf]  ;;  %v40_v48 = vsub.s32 1, %v35_v44  ;;  %v48_v49 = vsub.s32 3, %v35_v44 }
  0x25   :  { %626 = vmatprep.subr.bf16.mxu1 %v677_v40  ;;  %v557_v12 = vld [vmem:[%s870_s4] ss:$0 sm:$0xff]  ;;  %p687_p3 = por %p686_p2, %p685_p1 }
  0x26   :  { %v37_v50 = vrot.slane %v32_v47, %v36_v45  ;;  %v45_v51 = vrot.slane %v32_v47, %v44_v46  ;;  %v41_v52 = vrot.slane %v32_v47, %v40_v48  ;;  %v49_v53 = vrot.slane %v32_v47, %v48_v49 }
  0x27   :  { %605 = vmatpush3.bf16.msra.mxu0 %v678_v41  ;;  %p688_p4 = pnand %p687_p3, %p681_p0 }
  0x28   :  { %627 = vmatpush3.bf16.msra.mxu1 %v679_v42 }
  0xca   :  { %v132_v54 = vpop.f32.mrf.mxu0  ;;  %v173_v55 = vpop.f32.mrf.mxu1 }
  0xcb   :  { %v133_v56 = vadd.f32 %v132_v54, %v37_v50  ;;  %v174_v57 = vadd.f32 %v173_v55, %v45_v51 }
  0xcc   :  { %v134_v58 = vpop.f32.mrf.mxu0  ;;  %v175_v59 = vpop.f32.mrf.mxu1 }
  0xcd   :  { %v182_v60 = vmax.f32 %v174_v57, 0.0  ;;  %v135_v61 = vadd.f32 %v134_v58, %v41_v52  ;;  %v176_v62 = vadd.f32 %v175_v59, %v49_v53  ;;  %v180_v63 = vmax.f32 %v133_v56, 0.0 }
  0xce   :  { %v136_v0 = vpop.f32.mrf.mxu0  ;;  %v177_v1 = vpop.f32.mrf.mxu1 }
  0xcf   :  { %v181_v2 = vmax.f32 %v135_v61, 0.0  ;;  %v183_v3 = vmax.f32 %v176_v62, 0.0  ;;  %v186_v4 = vpack.c.bf16 %v182_v60, %v182_v60  ;;  %v184_v9 = vpack.c.bf16 %v180_v63, %v180_v63 }
  0xd0   :  { %v137_v5 = vpop.f32.mrf.mxu0  ;;  %v178_v6 = vpop.f32.mrf.mxu1 }
  0xd1   :  { %v185_v7 = vpack.c.bf16 %v181_v2, %v181_v2  ;;  %v187_v8 = vpack.c.bf16 %v183_v3, %v183_v3 }
  0xd3   :  { %483 = vmatprep.mubr.bf16.mxu0 %v185_v7  ;;  %523 = vmatprep.mubr.bf16.mxu1 %v187_v8 }
  0xd4   :  { %484 = vmatmul.mubr.bf16.vlgmr.msra.gmra.mxu0 %v184_v9  ;;  %524 = vmatmul.mubr.bf16.vlgmr.msra.gmra.mxu1 %v186_v4 }
 0x194   :  { %v606_v10 = vpop.f32.mrf.mxu0  ;;  %v628_v11 = vpop.f32.mrf.mxu1 }
 0x196   :  { %v607_v13 = vpop.f32.mrf.mxu0  ;;  %v629_v14 = vpop.f32.mrf.mxu1 }
 0x197   :  { %v608_v15 = vadd.f32 %v607_v13, %v606_v10  ;;  %v630_v19 = vadd.f32 %v629_v14, %v628_v11 }
 0x198   :  { %v609_v16 = vpop.f32.mrf.mxu0  ;;  %v631_v17 = vpop.f32.mrf.mxu1 }
 0x199   :  { %v486_v18 = vadd.f32 %v608_v15, %v557_v12 }
 0x19a   :  { %v610_v20 = vpop.f32.mrf.mxu0  ;;  %v632_v21 = vpop.f32.mrf.mxu1 }
 0x19b   :  { %v526_v22 = vadd.f32 %v630_v19, %v486_v18 }
 0x19d   :  { %532 = vst.msk [vmem:[#allocation2] sm:$0xff] %vm531_vm1, %v526_v22 }
 0x19e   :  { %691 = shalt.err (!%p688_p4)
}
 0x19f   :  { %542 = dma.vmem_to_hbm [thread:$0]  %s540_s22, 128, %s871_s5, [#allocation3]  }
 0x1a0   :  { %700 = dma.done.wait [#allocation3], 128  }
 0x1a1   :  { %701 = vsyncadd [#allocation3], 4294967168 }
 0x1a2   :  { %546 = vsyncpa [#allocation3], 1 }

</bundles_post_ra>
